<compile_context>
chip_gen: v7x
topology: tpu7x:2x2x1
jax: 0.10.0
libtpu: 0.0.40
codegen_flags: <defaults>
</compile_context>

<pallas_src>
import jax
import jax.numpy as jnp
from jax.experimental import pallas as pl
from jax.experimental.pallas import tpu as pltpu  # noqa: F401  (TPU backend)


# ------------------------------ helpers -------------------------------------


def _round_up(n, m):
    return ((n + m - 1) // m) * m


def _pad2(x, rows, cols):
    """Zero-pad a 2-D array up to (rows, cols)."""
    return jnp.pad(x, ((0, rows - x.shape[0]), (0, cols - x.shape[1])))


def _full_spec(shape):
    """BlockSpec covering the whole (padded, lane-dense) array; single block."""
    return pl.BlockSpec(shape, lambda: (0,) * len(shape))


# ------------------------------ fused kernel --------------------------------


def _gcn_fused_kernel(a_ref, x_ref,
                      w1_ref, b1_ref, w2_ref, b2_ref, w3_ref, b3_ref,
                      p_ref, wl_ref, bl_ref, o_ref):
    """relu(A(XW1)+b1) -> relu(A(.W2)+b2) -> A(.W3)+b3 -> (P .)Wlin + blin."""
    a = a_ref[...]          # [Np, Np] adjacency, loaded to vregs once
    h = x_ref[...]          # [Np, Cp]

    # --- GCNConv 1 + ReLU ---
    h = jnp.dot(h, w1_ref[...], preferred_element_type=jnp.float32)
    h = jnp.dot(a, h, preferred_element_type=jnp.float32) + b1_ref[...]
    h = jnp.maximum(h, 0.0)

    # --- GCNConv 2 + ReLU ---
    h = jnp.dot(h, w2_ref[...], preferred_element_type=jnp.float32)
    h = jnp.dot(a, h, preferred_element_type=jnp.float32) + b2_ref[...]
    h = jnp.maximum(h, 0.0)

    # --- GCNConv 3 (no ReLU) ---
    h = jnp.dot(h, w3_ref[...], preferred_element_type=jnp.float32)
    h = jnp.dot(a, h, preferred_element_type=jnp.float32) + b3_ref[...]

    # --- global_mean_pool (as matmul with pooling matrix) + Linear ---
    pooled = jnp.dot(p_ref[...], h, preferred_element_type=jnp.float32)
    out = jnp.dot(pooled, wl_ref[...], preferred_element_type=jnp.float32)
    out = out + bl_ref[...]

    o_ref[...] = out.astype(o_ref.dtype)  # lane-dense [Gp, 128] store


# ------------------------------ wrapper -------------------------------------


def gcn_forward(x, a_hat, pool_mat, params):
    """Fused GCN forward. x:[N,Cin], a_hat:[N,N], pool_mat:[G,N] -> [G,1]."""
    n, c_in = x.shape
    g = pool_mat.shape[0]
    dim_h = params["w1"].shape[1]
    out_dim = params["w_lin"].shape[1]

    # Padded, lane-dense (last dim multiple of 128, sublane multiple of 8) sizes.
    n_p = max(_round_up(n, 128), 128)
    cin_p = max(_round_up(c_in, 128), 128)
    h_p = max(_round_up(dim_h, 128), 128)
    out_p = max(_round_up(out_dim, 128), 128)
    g_p = max(_round_up(g, 8), 8)

    a_p = _pad2(a_hat.astype(jnp.float32), n_p, n_p)
    x_p = _pad2(x.astype(jnp.float32), n_p, cin_p)
    p_p = _pad2(pool_mat.astype(jnp.float32), g_p, n_p)

    w1 = _pad2(params["w1"], cin_p, h_p)
    w2 = _pad2(params["w2"], h_p, h_p)
    w3 = _pad2(params["w3"], h_p, h_p)
    wl = _pad2(params["w_lin"], h_p, out_p)
    b1 = _pad2(params["b1"].reshape(1, -1), 1, h_p)
    b2 = _pad2(params["b2"].reshape(1, -1), 1, h_p)
    b3 = _pad2(params["b3"].reshape(1, -1), 1, h_p)
    bl = _pad2(params["b_lin"].reshape(1, -1), 1, out_p)

    operands = (a_p, x_p, w1, b1, w2, b2, w3, b3, p_p, wl, bl)

    out_padded = pl.pallas_call(
        _gcn_fused_kernel,
        out_shape=jax.ShapeDtypeStruct((g_p, out_p), jnp.float32),
        in_specs=[_full_spec(op.shape) for op in operands],
        out_specs=_full_spec((g_p, out_p)),
    )(*operands)

    return out_padded[:g, :out_dim]


# --------------------------- graph preprocessing ----------------------------


def build_normalized_adjacency(edge_index, num_nodes):
    """A_hat = D^-1/2 (A + I) D^-1/2 as a dense [N, N] float32 matrix."""
    src, dst = edge_index
    a = jnp.zeros((num_nodes, num_nodes), jnp.float32)
    a = a.at[dst, src].add(1.0)                          # message flows src -> dst
    a = a + jnp.eye(num_nodes, dtype=jnp.float32)        # self loops
    deg = jnp.sum(a, axis=1)
    d_inv_sqrt = jnp.where(deg > 0, 1.0 / jnp.sqrt(deg), 0.0)
    return d_inv_sqrt[:, None] * a * d_inv_sqrt[None, :]


def build_pool_matrix(batch, num_graphs, num_nodes):
    """P[g, i] = 1/count_g if batch[i] == g else 0  (global_mean_pool)."""
    one_hot = (batch[None, :] == jnp.arange(num_graphs)[:, None]).astype(jnp.float32)
    counts = jnp.sum(one_hot, axis=1, keepdims=True)
    return one_hot / jnp.maximum(counts, 1.0)


# ------------------------------- main ---------------------------------------


if __name__ == "__main__":
    key = jax.random.PRNGKey(0)
    in_dim = 11
    dim_h = 32
    num_nodes = 12
    num_graphs = 2

    ks = jax.random.split(key, 10)

    def glorot(k, shape):
        lim = jnp.sqrt(6.0 / (shape[0] + shape[1]))
        return jax.random.uniform(k, shape, jnp.float32, -lim, lim)

    params = {
        "w1": glorot(ks[0], (in_dim, dim_h)),
        "b1": jnp.zeros((dim_h,), jnp.float32),
        "w2": glorot(ks[1], (dim_h, dim_h)),
        "b2": jnp.zeros((dim_h,), jnp.float32),
        "w3": glorot(ks[2], (dim_h, dim_h)),
        "b3": jnp.zeros((dim_h,), jnp.float32),
        "w_lin": glorot(ks[3], (dim_h, 1)),
        "b_lin": jnp.zeros((1,), jnp.float32),
    }

    # Deterministic synthetic batched graph: 2 graphs of 6 nodes each (ring).
    x = jax.random.normal(ks[4], (num_nodes, in_dim), jnp.float32)
    edges = []
    for g in range(num_graphs):
        base = g * 6
        for i in range(6):
            a, b = base + i, base + (i + 1) % 6
            edges.append((a, b))
            edges.append((b, a))
    edge_index = jnp.array(edges, jnp.int32).T            # [2, E]
    batch = jnp.repeat(jnp.arange(num_graphs, dtype=jnp.int32), 6)

    a_hat = build_normalized_adjacency(edge_index, num_nodes)
    pool_mat = build_pool_matrix(batch, num_graphs, num_nodes)

    out = gcn_forward(x, a_hat, pool_mat, params)          # [num_graphs, 1]
    jax.block_until_ready(out)

    # Pure-JAX reference check of the same math.
    h = jnp.maximum(a_hat @ (x @ params["w1"]) + params["b1"], 0.0)
    h = jnp.maximum(a_hat @ (h @ params["w2"]) + params["b2"], 0.0)
    h = a_hat @ (h @ params["w3"]) + params["b3"]
    ref = (pool_mat @ h) @ params["w_lin"] + params["b_lin"]
    assert out.shape == (num_graphs, 1)
    assert jnp.allclose(out, ref, atol=1e-4, rtol=1e-4)

    print("KERNEL_OK")
</pallas_src>

<mosaic_0001>
module attributes {stable_mosaic.version = 11 : i64} {
  func.func @_gcn_fused_kernel(%arg0: memref<128x128xf32, #tpu.memory_space<vmem>>, %arg1: memref<128x128xf32, #tpu.memory_space<vmem>>, %arg2: memref<128x128xf32, #tpu.memory_space<vmem>>, %arg3: memref<1x128xf32, #tpu.memory_space<vmem>>, %arg4: memref<128x128xf32, #tpu.memory_space<vmem>>, %arg5: memref<1x128xf32, #tpu.memory_space<vmem>>, %arg6: memref<128x128xf32, #tpu.memory_space<vmem>>, %arg7: memref<1x128xf32, #tpu.memory_space<vmem>>, %arg8: memref<8x128xf32, #tpu.memory_space<vmem>>, %arg9: memref<128x128xf32, #tpu.memory_space<vmem>>, %arg10: memref<1x128xf32, #tpu.memory_space<vmem>>, %arg11: memref<8x128xf32, #tpu.memory_space<vmem>>) attributes {dimension_semantics = [], scalar_prefetch = 0 : i64, scratch_operands = 0 : i64, tpu.core_type = #tpu.core_type<tc>} {
    %c0 = arith.constant 0 : index
    %c0_0 = arith.constant 0 : index
    %0 = vector.load %arg0[%c0, %c0_0] : memref<128x128xf32, #tpu.memory_space<vmem>>, vector<128x128xf32>
    %c0_1 = arith.constant 0 : index
    %c0_2 = arith.constant 0 : index
    %1 = vector.load %arg1[%c0_1, %c0_2] : memref<128x128xf32, #tpu.memory_space<vmem>>, vector<128x128xf32>
    %c0_3 = arith.constant 0 : index
    %c0_4 = arith.constant 0 : index
    %2 = vector.load %arg2[%c0_3, %c0_4] : memref<128x128xf32, #tpu.memory_space<vmem>>, vector<128x128xf32>
    %cst = arith.constant dense<0.000000e+00> : vector<128x128xf32>
    %3 = tpu.matmul %1, %2, %cst {dimension_numbers = #tpu.dot_dimension_numbers<[1], [0], [0], [1], [0, 0, 1, 1], [], []>} : vector<128x128xf32>, vector<128x128xf32>, vector<128x128xf32> -> vector<128x128xf32>
    %cst_5 = arith.constant dense<0.000000e+00> : vector<128x128xf32>
    %4 = tpu.matmul %0, %3, %cst_5 {dimension_numbers = #tpu.dot_dimension_numbers<[1], [0], [0], [1], [0, 0, 1, 1], [], []>} : vector<128x128xf32>, vector<128x128xf32>, vector<128x128xf32> -> vector<128x128xf32>
    %c0_6 = arith.constant 0 : index
    %c0_7 = arith.constant 0 : index
    %5 = vector.load %arg3[%c0_6, %c0_7] : memref<1x128xf32, #tpu.memory_space<vmem>>, vector<1x128xf32>
    %6 = vector.broadcast %5 : vector<1x128xf32> to vector<128x128xf32>
    %7 = arith.addf %4, %6 : vector<128x128xf32>
    %cst_8 = arith.constant 0.000000e+00 : f32
    %8 = vector.broadcast %cst_8 : f32 to vector<128x128xf32>
    %9 = arith.maximumf %7, %8 : vector<128x128xf32>
    %c0_9 = arith.constant 0 : index
    %c0_10 = arith.constant 0 : index
    %10 = vector.load %arg4[%c0_9, %c0_10] : memref<128x128xf32, #tpu.memory_space<vmem>>, vector<128x128xf32>
    %cst_11 = arith.constant dense<0.000000e+00> : vector<128x128xf32>
    %11 = tpu.matmul %9, %10, %cst_11 {dimension_numbers = #tpu.dot_dimension_numbers<[1], [0], [0], [1], [0, 0, 1, 1], [], []>} : vector<128x128xf32>, vector<128x128xf32>, vector<128x128xf32> -> vector<128x128xf32>
    %cst_12 = arith.constant dense<0.000000e+00> : vector<128x128xf32>
    %12 = tpu.matmul %0, %11, %cst_12 {dimension_numbers = #tpu.dot_dimension_numbers<[1], [0], [0], [1], [0, 0, 1, 1], [], []>} : vector<128x128xf32>, vector<128x128xf32>, vector<128x128xf32> -> vector<128x128xf32>
    %c0_13 = arith.constant 0 : index
    %c0_14 = arith.constant 0 : index
    %13 = vector.load %arg5[%c0_13, %c0_14] : memref<1x128xf32, #tpu.memory_space<vmem>>, vector<1x128xf32>
    %14 = vector.broadcast %13 : vector<1x128xf32> to vector<128x128xf32>
    %15 = arith.addf %12, %14 : vector<128x128xf32>
    %cst_15 = arith.constant 0.000000e+00 : f32
    %16 = vector.broadcast %cst_15 : f32 to vector<128x128xf32>
    %17 = arith.maximumf %15, %16 : vector<128x128xf32>
    %c0_16 = arith.constant 0 : index
    %c0_17 = arith.constant 0 : index
    %18 = vector.load %arg6[%c0_16, %c0_17] : memref<128x128xf32, #tpu.memory_space<vmem>>, vector<128x128xf32>
    %cst_18 = arith.constant dense<0.000000e+00> : vector<128x128xf32>
    %19 = tpu.matmul %17, %18, %cst_18 {dimension_numbers = #tpu.dot_dimension_numbers<[1], [0], [0], [1], [0, 0, 1, 1], [], []>} : vector<128x128xf32>, vector<128x128xf32>, vector<128x128xf32> -> vector<128x128xf32>
    %cst_19 = arith.constant dense<0.000000e+00> : vector<128x128xf32>
    %20 = tpu.matmul %0, %19, %cst_19 {dimension_numbers = #tpu.dot_dimension_numbers<[1], [0], [0], [1], [0, 0, 1, 1], [], []>} : vector<128x128xf32>, vector<128x128xf32>, vector<128x128xf32> -> vector<128x128xf32>
    %c0_20 = arith.constant 0 : index
    %c0_21 = arith.constant 0 : index
    %21 = vector.load %arg7[%c0_20, %c0_21] : memref<1x128xf32, #tpu.memory_space<vmem>>, vector<1x128xf32>
    %22 = vector.broadcast %21 : vector<1x128xf32> to vector<128x128xf32>
    %23 = arith.addf %20, %22 : vector<128x128xf32>
    %c0_22 = arith.constant 0 : index
    %c0_23 = arith.constant 0 : index
    %24 = vector.load %arg8[%c0_22, %c0_23] : memref<8x128xf32, #tpu.memory_space<vmem>>, vector<8x128xf32>
    %cst_24 = arith.constant dense<0.000000e+00> : vector<8x128xf32>
    %25 = tpu.matmul %24, %23, %cst_24 {dimension_numbers = #tpu.dot_dimension_numbers<[1], [0], [0], [1], [0, 0, 1, 1], [], []>} : vector<8x128xf32>, vector<128x128xf32>, vector<8x128xf32> -> vector<8x128xf32>
    %c0_25 = arith.constant 0 : index
    %c0_26 = arith.constant 0 : index
    %26 = vector.load %arg9[%c0_25, %c0_26] : memref<128x128xf32, #tpu.memory_space<vmem>>, vector<128x128xf32>
    %cst_27 = arith.constant dense<0.000000e+00> : vector<8x128xf32>
    %27 = tpu.matmul %25, %26, %cst_27 {dimension_numbers = #tpu.dot_dimension_numbers<[1], [0], [0], [1], [0, 0, 1, 1], [], []>} : vector<8x128xf32>, vector<128x128xf32>, vector<8x128xf32> -> vector<8x128xf32>
    %c0_28 = arith.constant 0 : index
    %c0_29 = arith.constant 0 : index
    %28 = vector.load %arg10[%c0_28, %c0_29] : memref<1x128xf32, #tpu.memory_space<vmem>>, vector<1x128xf32>
    %29 = vector.broadcast %28 : vector<1x128xf32> to vector<8x128xf32>
    %30 = arith.addf %27, %29 : vector<8x128xf32>
    %c0_30 = arith.constant 0 : index
    %c0_31 = arith.constant 0 : index
    %31 = vector.load %arg11[%c0_30, %c0_31] : memref<8x128xf32, #tpu.memory_space<vmem>>, vector<8x128xf32>
    tpu.vector_store %arg11[%c0_30, %c0_31], %30 {strides = array<i32>} : memref<8x128xf32, #tpu.memory_space<vmem>>, vector<8x128xf32>,
    return
  }
}

</mosaic_0001>

<bundles_post_ra>
// kernel: tpu_custom_call.1
= control target key start
LH: loop header
LB: loop body
LE: loop exit
PB: predicated region body
PF: predicated region fallthrough
CT: control target
= control target key end

     0   :  { %16 = vsyncpa [#allocation3], 0  ;;  %s2665_s0 = inlined_call_operand.hbm [shape: f32[128,128], index: 0, kind: input, shape index: {}]   ;;  %s2666_s1 = inlined_call_operand.hbm [shape: f32[128,128], index: 1, kind: input, shape index: {}]   ;;  %s2667_s2 = inlined_call_operand.hbm [shape: f32[128,128], index: 2, kind: input, shape index: {}]   ;;  %s2668_s3 = inlined_call_operand.vmem [shape: f32[1,128], index: 3, kind: input, shape index: {}]   ;;  %s2669_s4 = inlined_call_operand.hbm [shape: f32[128,128], index: 4, kind: input, shape index: {}]   ;;  %s2670_s5 = inlined_call_operand.vmem [shape: f32[1,128], index: 5, kind: input, shape index: {}]   ;;  %s2671_s6 = inlined_call_operand.hbm [shape: f32[128,128], index: 6, kind: input, shape index: {}]   ;;  %s2672_s7 = inlined_call_operand.vmem [shape: f32[1,128], index: 7, kind: input, shape index: {}]   ;;  %s2673_s8 = inlined_call_operand.vmem [shape: f32[8,128], index: 8, kind: input, shape index: {}]   ;;  %s2674_s9 = inlined_call_operand.hbm [shape: f32[128,128], index: 9, kind: input, shape index: {}]   ;;  %s2675_s10 = inlined_call_operand.vmem [shape: f32[1,128], index: 10, kind: input, shape index: {}]   ;;  %s2676_s11 = inlined_call_operand.hbm [shape: f32[8,128], index: 11, kind: output, shape index: {}]  }
   0x1   :  { %17 = vsyncpa [#allocation6], 0 }
   0x2   :  { %18 = vsyncpa [#allocation9], 0 }
   0x3   :  { %19 = vsyncpa [#allocation12], 0 }
   0x4   :  { %20 = vsyncpa [#allocation4], 0  ;;  %s2359_s17 = smov [#allocation5]   ;;  %s2360_s19 = smov [#allocation8]  }
   0x5   :  { %s38_s18 = sshll.u32 %s2359_s17, 4  ;;  %s64_s20 = sshll.u32 %s2360_s19, 4  ;;  %s39_s18 = int_to_ptr.vmem [resolvable:$true] %s38_s18  ;;  %s2431_s20 = int_to_ptr.vmem [resolvable:$true] %s64_s20 }
   0x6   :  { %s2195_s23 = scalar_lea.hbm %s2666_s1, 2048 }
   0x7   :  { %p2196_p0 = scmp.ne.s32.totalorder %s2666_s1, %s2195_s23  ;;  %p2199_p1 = scmp.lt.u32.totalorder %s2195_s23, %s2666_s1 }
   0x9   :  { %p2201_p2 = pnand %p2199_p1, %p2196_p0 }
   0xb   :  { %2204 = shalt.err (!%p2201_p2)
}
   0xc   :  { %s2205_s28 = scalar_lea.vmem %s39_s18, 2048  ;;  %p2210_p4 = scmp.lt.s32.totalorder %s39_s18, %s39_s18 }
   0xd   :  { %p2206_p3 = scmp.ne.s32.totalorder %s39_s18, %s2205_s28  ;;  %p2211_p5 = scmp.lt.s32.totalorder %s2205_s28, %s2205_s28 }
   0xf   :  { %p2212_p6 = por %p2211_p5, %p2210_p4 }
  0x11   :  { %p2213_p7 = pnand %p2212_p6, %p2206_p3 }
  0x13   :  { %2216 = shalt.err (!%p2213_p7)
}
  0x14   :  { %s2361_s29 = smov 128   ;;  %s2362_s30 = smov 8  }
  0x15   :  { %44 = dma.hbm_to_vmem [thread:$0]  %s2666_s1, 2048, %s39_s18, [#allocation6], %s2361_s29, %s2361_s29, %s2362_s30  }
  0x16   :  { %s2217_s16 = scalar_lea.hbm %s2669_s4, 2048 }
  0x17   :  { %p2218_p8 = scmp.ne.s32.totalorder %s2669_s4, %s2217_s16  ;;  %p2221_p9 = scmp.lt.u32.totalorder %s2217_s16, %s2669_s4 }
  0x19   :  { %p2223_p10 = pnand %p2221_p9, %p2218_p8 }
  0x1b   :  { %2226 = shalt.err (!%p2223_p10)
}
  0x1c   :  { %s2227_s23 = scalar_lea.vmem %s2431_s20, 2048  ;;  %p2232_p12 = scmp.lt.s32.totalorder %s2431_s20, %s2431_s20 }
  0x1d   :  { %p2228_p11 = scmp.ne.s32.totalorder %s2431_s20, %s2227_s23  ;;  %p2233_p13 = scmp.lt.s32.totalorder %s2227_s23, %s2227_s23 }
  0x1f   :  { %p2234_p0 = por %p2233_p13, %p2232_p12 }
  0x21   :  { %p2235_p1 = pnand %p2234_p0, %p2228_p11 }
  0x23   :  { %2238 = shalt.err (!%p2235_p1)
}
  0x24   :  { %70 = dma.hbm_to_vmem [thread:$0]  %s2669_s4, 2048, %s2431_s20, [#allocation9], %s2361_s29, %s2361_s29, %s2362_s30  }
  0x25   :  { %s2363_s24 = smov [#allocation2]   ;;  %s2364_s26 = smov [#allocation7]  }
  0x26   :  { %s26_s25 = sshll.u32 %s2363_s24, 4  ;;  %s50_s27 = sshll.u32 %s2364_s26, 4  ;;  %s27_s25 = int_to_ptr.vmem [resolvable:$true] %s26_s25  ;;  %s2468_s27 = int_to_ptr.vmem [resolvable:$true] %s50_s27 }
  0x27   :  { %s2239_s13 = scalar_lea.hbm %s2665_s0, 2048 }
  0x28   :  { %p2240_p2 = scmp.ne.s32.totalorder %s2665_s0, %s2239_s13  ;;  %p2243_p3 = scmp.lt.u32.totalorder %s2239_s13, %s2665_s0 }
  0x2a   :  { %p2245_p4 = pnand %p2243_p3, %p2240_p2 }
  0x2c   :  { %2248 = shalt.err (!%p2245_p4)
}
  0x2d   :  { %s2249_s4 = scalar_lea.vmem %s27_s25, 2048  ;;  %p2254_p6 = scmp.lt.s32.totalorder %s27_s25, %s27_s25 }
  0x2e   :  { %p2250_p5 = scmp.ne.s32.totalorder %s27_s25, %s2249_s4  ;;  %p2255_p7 = scmp.lt.s32.totalorder %s2249_s4, %s2249_s4 }
  0x30   :  { %p2256_p8 = por %p2255_p7, %p2254_p6 }
  0x32   :  { %p2257_p9 = pnand %p2256_p8, %p2250_p5 }
  0x34   :  { %2260 = shalt.err (!%p2257_p9)
}
  0x35   :  { %32 = dma.hbm_to_vmem [thread:$0]  %s2665_s0, 2048, %s27_s25, [#allocation3], %s2361_s29, %s2361_s29, %s2362_s30  }
  0x36   :  { %s2261_s23 = scalar_lea.hbm %s2667_s2, 2048 }
  0x37   :  { %p2262_p10 = scmp.ne.s32.totalorder %s2667_s2, %s2261_s23  ;;  %p2265_p11 = scmp.lt.u32.totalorder %s2261_s23, %s2667_s2 }
  0x39   :  { %p2267_p12 = pnand %p2265_p11, %p2262_p10 }
  0x3b   :  { %2270 = shalt.err (!%p2267_p12)
}
  0x3c   :  { %s2271_s28 = scalar_lea.vmem %s2468_s27, 2048  ;;  %p2276_p0 = scmp.lt.s32.totalorder %s2468_s27, %s2468_s27 }
  0x3d   :  { %p2272_p13 = scmp.ne.s32.totalorder %s2468_s27, %s2271_s28  ;;  %p2277_p1 = scmp.lt.s32.totalorder %s2271_s28, %s2271_s28 }
  0x3f   :  { %p2278_p2 = por %p2277_p1, %p2276_p0 }
  0x41   :  { %p2279_p3 = pnand %p2278_p2, %p2272_p13 }
  0x43   :  { %2282 = shalt.err (!%p2279_p3)
}
  0x44   :  { %56 = dma.hbm_to_vmem [thread:$0]  %s2667_s2, 2048, %s2468_s27, [#allocation6], %s2361_s29, %s2361_s29, %s2362_s30  }
  0x45   :  { %s2365_s12 = smov [#allocation10]   ;;  %s2366_s14 = smov [#allocation11]  }
  0x46   :  { %s78_s13 = sshll.u32 %s2365_s12, 4  ;;  %s94_s15 = sshll.u32 %s2366_s14, 4  ;;  %s79_s13 = int_to_ptr.vmem [resolvable:$true] %s78_s13  ;;  %s2505_s15 = int_to_ptr.vmem [resolvable:$true] %s94_s15 }
  0x47   :  { %s2283_s4 = scalar_lea.hbm %s2671_s6, 2048 }
  0x48   :  { %p2284_p4 = scmp.ne.s32.totalorder %s2671_s6, %s2283_s4  ;;  %p2287_p5 = scmp.lt.u32.totalorder %s2283_s4, %s2671_s6 }
  0x4a   :  { %p2289_p6 = pnand %p2287_p5, %p2284_p4 }
  0x4c   :  { %2292 = shalt.err (!%p2289_p6)
}
  0x4d   :  { %s2293_s2 = scalar_lea.vmem %s79_s13, 2048  ;;  %p2298_p8 = scmp.lt.s32.totalorder %s79_s13, %s79_s13 }
  0x4e   :  { %p2294_p7 = scmp.ne.s32.totalorder %s79_s13, %s2293_s2  ;;  %p2299_p9 = scmp.lt.s32.totalorder %s2293_s2, %s2293_s2 }
  0x50   :  { %p2300_p10 = por %p2299_p9, %p2298_p8 }
  0x52   :  { %p2301_p11 = pnand %p2300_p10, %p2294_p7 }
  0x54   :  { %2304 = shalt.err (!%p2301_p11)
}
  0x55   :  { %84 = dma.hbm_to_vmem [thread:$0]  %s2671_s6, 2048, %s79_s13, [#allocation9], %s2361_s29, %s2361_s29, %s2362_s30  }
  0x56   :  { %s2305_s24 = scalar_lea.hbm %s2674_s9, 2048 }
  0x57   :  { %p2306_p12 = scmp.ne.s32.totalorder %s2674_s9, %s2305_s24  ;;  %p2309_p13 = scmp.lt.u32.totalorder %s2305_s24, %s2674_s9 }
  0x59   :  { %p2311_p0 = pnand %p2309_p13, %p2306_p12 }
  0x5b   :  { %2314 = shalt.err (!%p2311_p0)
}
  0x5c   :  { %s2315_s12 = scalar_lea.vmem %s2505_s15, 2048  ;;  %p2320_p2 = scmp.lt.s32.totalorder %s2505_s15, %s2505_s15 }
  0x5d   :  { %p2316_p1 = scmp.ne.s32.totalorder %s2505_s15, %s2315_s12  ;;  %p2321_p3 = scmp.lt.s32.totalorder %s2315_s12, %s2315_s12 }
  0x5f   :  { %p2322_p4 = por %p2321_p3, %p2320_p2 }
  0x61   :  { %p2323_p5 = pnand %p2322_p4, %p2316_p1 }
  0x63   :  { %2326 = shalt.err (!%p2323_p5)
}
  0x64   :  { %100 = dma.hbm_to_vmem [thread:$0]  %s2674_s9, 2048, %s2505_s15, [#allocation12], %s2361_s29, %s2361_s29, %s2362_s30  }
  0x65   :  { %2349 = dma.done.wait [#allocation3], 2048  }
  0x66   :  { %2350 = vsyncadd [#allocation3], 4294965248 }
  0x67   :  { %2351 = dma.done.wait [#allocation6], 4096  }
  0x68   :  { %2352 = vsyncadd [#allocation6], 4294963200 }
  0x69   :  { %2353 = dma.done.wait [#allocation9], 4096  }
  0x6a   :  { %2354 = vsyncadd [#allocation9], 4294963200 }
  0x6b   :  { %2355 = dma.done.wait [#allocation12], 2048  }
  0x6c   :  { %2356 = vsyncadd [#allocation12], 4294965248  ;;  %v153_v0 = vld [vmem:[#allocation7] sm:$0xff]  ;;  %v154_v1 = vld [vmem:[#allocation7 + $0x8] sm:$0xff]  ;;  %vm2368_vm0 = vmmov 0   ;;  %s2370_s4 = smov [#allocation13]  }
  0x6d   :  { %v155_v2 = vld [vmem:[#allocation7 + $0x10] sm:$0xff]  ;;  %v1943_v3 = vpack.c.bf16 %v154_v1, %v153_v0  ;;  %v156_v4 = vld [vmem:[#allocation7 + $0x18] sm:$0xff]  ;;  %v157_v6 = vld [vmem:[#allocation7 + $0x20] sm:$0xff]  ;;  %s1295_s20 = sshll.u32 %s2370_s4, 4  ;;  %s1296_s20 = int_to_ptr.vmem [resolvable:$true] %s1295_s20 }
  0x6e   :  { %v1947_v5 = vpack.c.bf16 %v156_v4, %v155_v2  ;;  %v158_v7 = vld [vmem:[#allocation7 + $0x28] sm:$0xff]  ;;  %v137_v9 = vld [vmem:[#allocation5] sm:$0xff]  ;;  %v159_v10 = vld [vmem:[#allocation7 + $0x30] sm:$0xff]  ;;  %s2327_s19 = scalar_lea.vmem %s1296_s20, 128  ;;  %p2332_p7 = scmp.lt.s32.totalorder %s1296_s20, %s1296_s20 }
  0x6f   :  { %1944 = vmatprep.subr.bf16.mxu0 %v1943_v3  ;;  %v1951_v8 = vpack.c.bf16 %v158_v7, %v157_v6  ;;  %v160_v11 = vld [vmem:[#allocation7 + $0x38] sm:$0xff]  ;;  %1569 = vmatprep.mubr.f32.mxu0 %v137_v9  ;;  %v161_v13 = vld [vmem:[#allocation7 + $0x40] sm:$0xff]  ;;  %v162_v14 = vld [vmem:[#allocation7 + $0x48] sm:$0xff]  ;;  %p2328_p6 = scmp.ne.s32.totalorder %s1296_s20, %s2327_s19  ;;  %p2333_p8 = scmp.lt.s32.totalorder %s2327_s19, %s2327_s19 }
  0x70   :  { %1946 = vmatpush3.bf16.msra.mxu0 %v1943_v3  ;;  %v1955_v12 = vpack.c.bf16 %v160_v11, %v159_v10  ;;  %v1959_v15 = vpack.c.bf16 %v162_v14, %v161_v13  ;;  %v163_v16 = vld [vmem:[#allocation7 + $0x50] sm:$0xff]  ;;  %v164_v17 = vld [vmem:[#allocation7 + $0x58] sm:$0xff]  ;;  %v165_v19 = vld [vmem:[#allocation7 + $0x60] sm:$0xff] }
  0x71   :  { %1948 = vmatprep.subr.bf16.mxu0 %v1947_v5  ;;  %v1963_v18 = vpack.c.bf16 %v164_v17, %v163_v16  ;;  %v166_v20 = vld [vmem:[#allocation7 + $0x68] sm:$0xff]  ;;  %v167_v22 = vld [vmem:[#allocation7 + $0x70] sm:$0xff]  ;;  %v168_v23 = vld [vmem:[#allocation7 + $0x78] sm:$0xff]  ;;  %p2334_p9 = por %p2333_p8, %p2332_p7 }
  0x72   :  { %v1967_v21 = vpack.c.bf16 %v166_v20, %v165_v19  ;;  %v1971_v24 = vpack.c.bf16 %v168_v23, %v167_v22  ;;  %v138_v25 = vld [vmem:[#allocation5 + $0x8] sm:$0xff]  ;;  %v139_v26 = vld [vmem:[#allocation5 + $0x10] sm:$0xff]  ;;  %v140_v27 = vld [vmem:[#allocation5 + $0x18] sm:$0xff] }
  0x73   :  { %v141_v28 = vld [vmem:[#allocation5 + $0x20] sm:$0xff]  ;;  %v142_v29 = vld [vmem:[#allocation5 + $0x28] sm:$0xff]  ;;  %v143_v30 = vld [vmem:[#allocation5 + $0x30] sm:$0xff]  ;;  %p2335_p10 = pnand %p2334_p9, %p2328_p6 }
  0x74   :  { %1950 = vmatpush3.bf16.msra.mxu0 %v1947_v5  ;;  %v144_v31 = vld [vmem:[#allocation5 + $0x38] sm:$0xff]  ;;  %v145_v32 = vld [vmem:[#allocation5 + $0x40] sm:$0xff]  ;;  %v146_v33 = vld [vmem:[#allocation5 + $0x48] sm:$0xff] }
  0x75   :  { %1952 = vmatprep.subr.bf16.mxu0 %v1951_v8  ;;  %v147_v34 = vld [vmem:[#allocation5 + $0x50] sm:$0xff]  ;;  %v148_v35 = vld [vmem:[#allocation5 + $0x58] sm:$0xff]  ;;  %v149_v36 = vld [vmem:[#allocation5 + $0x60] sm:$0xff] }
  0x76   :  { %v150_v37 = vld [vmem:[#allocation5 + $0x68] sm:$0xff]  ;;  %v151_v38 = vld [vmem:[#allocation5 + $0x70] sm:$0xff]  ;;  %v152_v39 = vld [vmem:[#allocation5 + $0x78] sm:$0xff] }
  0x77   :  { %v2542_v40 = vld [vmem:[#allocation2] sm:$0xff]  ;;  %v483_v42 = vld [vmem:[#allocation8 + $0x8] sm:$0xff]  ;;  %v484_v43 = vld [vmem:[#allocation8 + $0x10] sm:$0xff] }
  0x78   :  { %1954 = vmatpush3.bf16.msra.mxu0 %v1951_v8  ;;  %1625 = vmatprep.mubr.f32.mxu1 %v2542_v40  ;;  %v482_v41 = vld [vmem:[#allocation8] sm:$0xff]  ;;  %v485_v45 = vld [vmem:[#allocation8 + $0x18] sm:$0xff]  ;;  %v487_v48 = vld [vmem:[#allocation8 + $0x28] sm:$0xff] }
  0x79   :  { %1956 = vmatprep.subr.bf16.mxu0 %v1955_v12  ;;  %v2007_v44 = vpack.c.bf16 %v483_v42, %v482_v41  ;;  %v2011_v46 = vpack.c.bf16 %v485_v45, %v484_v43  ;;  %v486_v47 = vld [vmem:[#allocation8 + $0x20] sm:$0xff]  ;;  %v488_v50 = vld [vmem:[#allocation8 + $0x30] sm:$0xff]  ;;  %v489_v51 = vld [vmem:[#allocation8 + $0x38] sm:$0xff] }
  0x7a   :  { %v2015_v49 = vpack.c.bf16 %v487_v48, %v486_v47  ;;  %v2019_v52 = vpack.c.bf16 %v489_v51, %v488_v50  ;;  %v490_v53 = vld [vmem:[#allocation8 + $0x40] sm:$0xff]  ;;  %v491_v54 = vld [vmem:[#allocation8 + $0x48] sm:$0xff]  ;;  %v492_v56 = vld [vmem:[#allocation8 + $0x50] sm:$0xff] }
  0x7b   :  { %v2023_v55 = vpack.c.bf16 %v491_v54, %v490_v53  ;;  %v493_v57 = vld [vmem:[#allocation8 + $0x58] sm:$0xff]  ;;  %v494_v59 = vld [vmem:[#allocation8 + $0x60] sm:$0xff]  ;;  %v495_v60 = vld [vmem:[#allocation8 + $0x68] sm:$0xff] }
  0x7c   :  { %1958 = vmatpush3.bf16.msra.mxu0 %v1955_v12  ;;  %v2027_v58 = vpack.c.bf16 %v493_v57, %v492_v56  ;;  %v2031_v61 = vpack.c.bf16 %v495_v60, %v494_v59  ;;  %v2545_v22 = vld [vmem:[#allocation2 + $0x8] sm:$0xff]  ;;  %v2547_v23 = vld [vmem:[#allocation2 + $0x10] sm:$0xff]  ;;  %v1307_v41 = vld [vmem:[%s2668_s3] ss:$0 sm:$0xff] }
  0x7d   :  { %1960 = vmatprep.subr.bf16.mxu0 %v1959_v15 }
  0x80   :  { %1962 = vmatpush3.bf16.msra.mxu0 %v1959_v15 }
  0x81   :  { %1964 = vmatprep.subr.bf16.mxu0 %v1963_v18 }
  0x84   :  { %1966 = vmatpush3.bf16.msra.mxu0 %v1963_v18 }
  0x85   :  { %1968 = vmatprep.subr.bf16.mxu0 %v1967_v21 }
  0x88   :  { %1970 = vmatpush3.bf16.msra.mxu0 %v1967_v21 }
  0x89   :  { %1972 = vmatprep.subr.bf16.mxu0 %v1971_v24 }
  0x8c   :  { %1974 = vmatpush3.bf16.msra.mxu0 %v1971_v24  ;;  %v2551_v24 = vld [vmem:[#allocation2 + $0x18] sm:$0xff] }
  0x8d   :  { %2008 = vmatprep.subr.bf16.mxu0 %v2007_v44 }
  0x8f   :  { %1570 = vmatmul.mubr.f32.vlgmr.msra.gmra.mrb[0].mxu0 %v138_v25  ;;  %v2553_v25 = vld [vmem:[#allocation2 + $0x20] sm:$0xff] }
  0x90   :  { %1572 = vmatprep.mubr.f32.mxu0 %v139_v26  ;;  %2010 = vmatpush3.bf16.msra.mxu0 %v2007_v44  ;;  %v2557_v26 = vld [vmem:[#allocation2 + $0x28] sm:$0xff] }
  0x91   :  { %2012 = vmatprep.subr.bf16.mxu0 %v2011_v46 }
  0x93   :  { %1573 = vmatmul.mubr.f32.gmra.mrb[2].mxu0 %v140_v27  ;;  %v2559_v27 = vld [vmem:[#allocation2 + $0x30] sm:$0xff] }
  0x94   :  { %1575 = vmatprep.mubr.f32.mxu0 %v141_v28  ;;  %2014 = vmatpush3.bf16.msra.mxu0 %v2011_v46  ;;  %v2563_v28 = vld [vmem:[#allocation2 + $0x38] sm:$0xff] }
  0x95   :  { %2016 = vmatprep.subr.bf16.mxu0 %v2015_v49 }
  0x97   :  { %1576 = vmatmul.mubr.f32.gmra.mrb[4].mxu0 %v142_v29  ;;  %v2565_v29 = vld [vmem:[#allocation2 + $0x40] sm:$0xff] }
  0x98   :  { %1578 = vmatprep.mubr.f32.mxu0 %v143_v30  ;;  %2018 = vmatpush3.bf16.msra.mxu0 %v2015_v49  ;;  %v2569_v30 = vld [vmem:[#allocation2 + $0x48] sm:$0xff] }
  0x99   :  { %2020 = vmatprep.subr.bf16.mxu0 %v2019_v52 }
  0x9b   :  { %1579 = vmatmul.mubr.f32.gmra.mrb[6].mxu0 %v144_v31  ;;  %v2571_v31 = vld [vmem:[#allocation2 + $0x50] sm:$0xff] }
  0x9c   :  { %1581 = vmatprep.mubr.f32.mxu0 %v145_v32  ;;  %2022 = vmatpush3.bf16.msra.mxu0 %v2019_v52  ;;  %v2575_v32 = vld [vmem:[#allocation2 + $0x58] sm:$0xff] }
  0x9d   :  { %2024 = vmatprep.subr.bf16.mxu0 %v2023_v55 }
  0x9f   :  { %1582 = vmatmul.mubr.f32.gmra.mrb[8].mxu0 %v146_v33  ;;  %v2577_v33 = vld [vmem:[#allocation2 + $0x60] sm:$0xff] }
  0xa0   :  { %1584 = vmatprep.mubr.f32.mxu0 %v147_v34  ;;  %2026 = vmatpush3.bf16.msra.mxu0 %v2023_v55  ;;  %v2581_v34 = vld [vmem:[#allocation2 + $0x68] sm:$0xff] }
  0xa1   :  { %2028 = vmatprep.subr.bf16.mxu0 %v2027_v58 }
  0xa3   :  { %1585 = vmatmul.mubr.f32.gmra.mrb[10].mxu0 %v148_v35  ;;  %v2583_v35 = vld [vmem:[#allocation2 + $0x70] sm:$0xff] }
  0xa4   :  { %1587 = vmatprep.mubr.f32.mxu0 %v149_v36  ;;  %2030 = vmatpush3.bf16.msra.mxu0 %v2027_v58  ;;  %v2587_v36 = vld [vmem:[#allocation2 + $0x78] sm:$0xff] }
  0xa5   :  { %2032 = vmatprep.subr.bf16.mxu0 %v2031_v61 }
  0xa7   :  { %1588 = vmatmul.mubr.f32.gmra.mrb[12].mxu0 %v150_v37  ;;  %v496_v37 = vld [vmem:[#allocation8 + $0x70] sm:$0xff] }
  0xa8   :  { %1590 = vmatprep.mubr.f32.mxu0 %v151_v38  ;;  %2034 = vmatpush3.bf16.msra.mxu0 %v2031_v61  ;;  %v497_v38 = vld [vmem:[#allocation8 + $0x78] sm:$0xff] }
  0xab   :  { %1591 = vmatmul.mubr.f32.gmra.mrb[14].mxu0 %v152_v39  ;;  %v2035_v39 = vpack.c.bf16 %v497_v38, %v496_v37 }
  0xad   :  { %2036 = vmatprep.subr.bf16.mxu0 %v2035_v39 }
  0xae   :  { %2038 = vmatpush3.bf16.msra.mxu0 %v2035_v39 }
 0x162   :  { %v1571_v62 = vpop.f32.mrb[0].mxu0 }
 0x163   :  { %v235_v63 = vpop.f32.mrb[1].mxu0 }
 0x164   :  { %v1975_v0 = vpack.c.bf16 %v1571_v62, %v235_v63 }
 0x166   :  { %v1574_v1 = vpop.f32.mrb[2].mxu0  ;;  %1976 = vmatprep.subr.bf16.mxu1 %v1975_v0 }
 0x167   :  { %v245_v2 = vpop.f32.mrb[3].mxu0  ;;  %1978 = vmatpush3.bf16.msra.mxu1 %v1975_v0 }
 0x168   :  { %v1979_v3 = vpack.c.bf16 %v1574_v1, %v245_v2 }
 0x16a   :  { %v1577_v4 = vpop.f32.mrb[4].mxu0  ;;  %1980 = vmatprep.subr.bf16.mxu1 %v1979_v3 }
 0x16b   :  { %v255_v5 = vpop.f32.mrb[5].mxu0  ;;  %1982 = vmatpush3.bf16.msra.mxu1 %v1979_v3 }
 0x16c   :  { %v1983_v6 = vpack.c.bf16 %v1577_v4, %v255_v5 }
 0x16e   :  { %v1580_v7 = vpop.f32.mrb[6].mxu0  ;;  %1984 = vmatprep.subr.bf16.mxu1 %v1983_v6 }
 0x16f   :  { %v265_v8 = vpop.f32.mrb[7].mxu0  ;;  %1986 = vmatpush3.bf16.msra.mxu1 %v1983_v6 }
 0x170   :  { %v1987_v9 = vpack.c.bf16 %v1580_v7, %v265_v8 }
 0x172   :  { %v1583_v10 = vpop.f32.mrb[8].mxu0  ;;  %1988 = vmatprep.subr.bf16.mxu1 %v1987_v9 }
 0x173   :  { %v275_v11 = vpop.f32.mrb[9].mxu0  ;;  %1990 = vmatpush3.bf16.msra.mxu1 %v1987_v9 }
 0x174   :  { %v1991_v12 = vpack.c.bf16 %v1583_v10, %v275_v11 }
 0x176   :  { %v1586_v13 = vpop.f32.mrb[10].mxu0  ;;  %1992 = vmatprep.subr.bf16.mxu1 %v1991_v12 }
 0x177   :  { %v285_v14 = vpop.f32.mrb[11].mxu0  ;;  %1994 = vmatpush3.bf16.msra.mxu1 %v1991_v12 }
 0x178   :  { %v1995_v15 = vpack.c.bf16 %v1586_v13, %v285_v14 }
 0x17a   :  { %v1589_v16 = vpop.f32.mrb[12].mxu0  ;;  %1996 = vmatprep.subr.bf16.mxu1 %v1995_v15 }
 0x17b   :  { %v295_v17 = vpop.f32.mrb[13].mxu0  ;;  %1998 = vmatpush3.bf16.msra.mxu1 %v1995_v15 }
 0x17c   :  { %v1999_v18 = vpack.c.bf16 %v1589_v16, %v295_v17 }
 0x17e   :  { %v1592_v19 = vpop.f32.mrb[14].mxu0  ;;  %2000 = vmatprep.subr.bf16.mxu1 %v1999_v18 }
 0x17f   :  { %v305_v20 = vpop.f32.mrb[15].mxu0  ;;  %2002 = vmatpush3.bf16.msra.mxu1 %v1999_v18 }
 0x180   :  { %v2003_v21 = vpack.c.bf16 %v1592_v19, %v305_v20 }
 0x182   :  { %2004 = vmatprep.subr.bf16.mxu1 %v2003_v21 }
 0x183   :  { %2006 = vmatpush3.bf16.msra.mxu1 %v2003_v21 }
 0x186   :  { %1626 = vmatmul.mubr.f32.vlgmr.msra.gmra.mrb[0].mxu1 %v2545_v22 }
 0x187   :  { %1628 = vmatprep.mubr.f32.mxu1 %v2547_v23 }
 0x18a   :  { %1629 = vmatmul.mubr.f32.gmra.mrb[2].mxu1 %v2551_v24 }
 0x18b   :  { %1631 = vmatprep.mubr.f32.mxu1 %v2553_v25 }
 0x18e   :  { %1632 = vmatmul.mubr.f32.gmra.mrb[4].mxu1 %v2557_v26 }
 0x18f   :  { %1634 = vmatprep.mubr.f32.mxu1 %v2559_v27 }
 0x192   :  { %1635 = vmatmul.mubr.f32.gmra.mrb[6].mxu1 %v2563_v28 }
 0x193   :  { %1637 = vmatprep.mubr.f32.mxu1 %v2565_v29 }
 0x196   :  { %1638 = vmatmul.mubr.f32.gmra.mrb[8].mxu1 %v2569_v30 }
 0x197   :  { %1640 = vmatprep.mubr.f32.mxu1 %v2571_v31 }
 0x19a   :  { %1641 = vmatmul.mubr.f32.gmra.mrb[10].mxu1 %v2575_v32 }
 0x19b   :  { %1643 = vmatprep.mubr.f32.mxu1 %v2577_v33 }
 0x19e   :  { %1644 = vmatmul.mubr.f32.gmra.mrb[12].mxu1 %v2581_v34 }
 0x19f   :  { %1646 = vmatprep.mubr.f32.mxu1 %v2583_v35 }
 0x1a2   :  { %1647 = vmatmul.mubr.f32.gmra.mrb[14].mxu1 %v2587_v36 }
 0x1a3   :  { %1737 = vmatprep.mubr.f32.mxu1 %v2542_v40 }
 0x259   :  { %v1627_v42 = vpop.f32.mrb[0].mxu1 }
 0x25a   :  { %v393_v43 = vadd.f32 %v1627_v42, %v1307_v41  ;;  %v387_v44 = vpop.f32.mrb[1].mxu1 }
 0x25b   :  { %v388_v45 = vadd.f32 %v1307_v41, %v387_v44  ;;  %v812_v44 = vld [vmem:[#allocation10 + $0x8] sm:$0xff] }
 0x25c   :  { %v467_v48 = vmax.f32 %v393_v43, 0.0  ;;  %v811_v43 = vld [vmem:[#allocation10] sm:$0xff] }
 0x25d   :  { %v466_v46 = vmax.f32 %v388_v45, 0.0  ;;  %v1630_v47 = vpop.f32.mrb[2].mxu1  ;;  %v813_v45 = vld [vmem:[#allocation10 + $0x10] sm:$0xff] }
 0x25e   :  { %v403_v49 = vadd.f32 %v1630_v47, %v1307_v41  ;;  %v397_v50 = vpop.f32.mrb[3].mxu1  ;;  %v814_v47 = vld [vmem:[#allocation10 + $0x18] sm:$0xff] }
 0x25f   :  { %v398_v51 = vadd.f32 %v1307_v41, %v397_v50  ;;  %1681 = vmatprep.mubr.f32.mxu0 %v466_v46  ;;  %v2071_v46 = vpack.c.bf16 %v812_v44, %v811_v43  ;;  %v816_v50 = vld [vmem:[#allocation10 + $0x28] sm:$0xff]  ;;  %v1308_v43 = vld [vmem:[%s2670_s5] ss:$0 sm:$0xff] }
 0x260   :  { %1682 = vmatmul.mubr.f32.vlgmr.msra.gmra.mrb[16].mxu0 %v467_v48  ;;  %v469_v54 = vmax.f32 %v403_v49, 0.0  ;;  %v2075_v48 = vpack.c.bf16 %v814_v47, %v813_v45  ;;  %v815_v49 = vld [vmem:[#allocation10 + $0x20] sm:$0xff] }
 0x261   :  { %v468_v52 = vmax.f32 %v398_v51, 0.0  ;;  %v1633_v53 = vpop.f32.mrb[4].mxu1  ;;  %2072 = vmatprep.subr.bf16.mxu0 %v2071_v46  ;;  %v2079_v51 = vpack.c.bf16 %v816_v50, %v815_v49 }
 0x262   :  { %v413_v55 = vadd.f32 %v1633_v53, %v1307_v41  ;;  %v407_v56 = vpop.f32.mrb[5].mxu1  ;;  %2074 = vmatpush3.bf16.msra.mxu0 %v2071_v46 }
 0x263   :  { %v408_v57 = vadd.f32 %v1307_v41, %v407_v56  ;;  %1684 = vmatprep.mubr.f32.mxu0 %v468_v52  ;;  %2076 = vmatprep.subr.bf16.mxu0 %v2075_v48  ;;  %v817_v52 = vld [vmem:[#allocation10 + $0x30] sm:$0xff] }
 0x264   :  { %1685 = vmatmul.mubr.f32.gmra.mrb[18].mxu0 %v469_v54  ;;  %v471_v60 = vmax.f32 %v413_v55, 0.0  ;;  %v819_v54 = vld [vmem:[#allocation10 + $0x40] sm:$0xff]  ;;  %v820_v55 = vld [vmem:[#allocation10 + $0x48] sm:$0xff] }
 0x265   :  { %v470_v58 = vmax.f32 %v408_v57, 0.0  ;;  %v1636_v59 = vpop.f32.mrb[6].mxu1  ;;  %v2087_v56 = vpack.c.bf16 %v820_v55, %v819_v54  ;;  %v821_v57 = vld [vmem:[#allocation10 + $0x50] sm:$0xff] }
 0x266   :  { %v423_v61 = vadd.f32 %v1636_v59, %v1307_v41  ;;  %v417_v62 = vpop.f32.mrb[7].mxu1  ;;  %2078 = vmatpush3.bf16.msra.mxu0 %v2075_v48 }
 0x267   :  { %v418_v63 = vadd.f32 %v1307_v41, %v417_v62  ;;  %1687 = vmatprep.mubr.f32.mxu0 %v470_v58  ;;  %2080 = vmatprep.subr.bf16.mxu0 %v2079_v51  ;;  %v822_v58 = vld [vmem:[#allocation10 + $0x58] sm:$0xff] }
 0x268   :  { %1688 = vmatmul.mubr.f32.gmra.mrb[20].mxu0 %v471_v60  ;;  %v473_v2 = vmax.f32 %v423_v61, 0.0  ;;  %v2091_v59 = vpack.c.bf16 %v822_v58, %v821_v57  ;;  %v823_v60 = vld [vmem:[#allocation10 + $0x60] sm:$0xff]  ;;  %v824_v61 = vld [vmem:[#allocation10 + $0x68] sm:$0xff] }
 0x269   :  { %v472_v0 = vmax.f32 %v418_v63, 0.0  ;;  %v1639_v1 = vpop.f32.mrb[8].mxu1  ;;  %v2095_v62 = vpack.c.bf16 %v824_v61, %v823_v60 }
 0x26a   :  { %v433_v3 = vadd.f32 %v1639_v1, %v1307_v41  ;;  %v427_v4 = vpop.f32.mrb[9].mxu1  ;;  %2082 = vmatpush3.bf16.msra.mxu0 %v2079_v51 }
 0x26b   :  { %v428_v5 = vadd.f32 %v1307_v41, %v427_v4  ;;  %1690 = vmatprep.mubr.f32.mxu0 %v472_v0 }
 0x26c   :  { %1691 = vmatmul.mubr.f32.gmra.mrb[22].mxu0 %v473_v2  ;;  %v475_v8 = vmax.f32 %v433_v3, 0.0 }
 0x26d   :  { %v474_v6 = vmax.f32 %v428_v5, 0.0  ;;  %v1642_v7 = vpop.f32.mrb[10].mxu1 }
 0x26e   :  { %v443_v9 = vadd.f32 %v1642_v7, %v1307_v41  ;;  %v437_v10 = vpop.f32.mrb[11].mxu1 }
 0x26f   :  { %v438_v11 = vadd.f32 %v1307_v41, %v437_v10  ;;  %1693 = vmatprep.mubr.f32.mxu0 %v474_v6 }
 0x270   :  { %1694 = vmatmul.mubr.f32.gmra.mrb[24].mxu0 %v475_v8  ;;  %v477_v14 = vmax.f32 %v443_v9, 0.0 }
 0x271   :  { %v476_v12 = vmax.f32 %v438_v11, 0.0  ;;  %v1645_v13 = vpop.f32.mrb[12].mxu1 }
 0x272   :  { %v453_v15 = vadd.f32 %v1645_v13, %v1307_v41  ;;  %v447_v16 = vpop.f32.mrb[13].mxu1 }
 0x273   :  { %v448_v17 = vadd.f32 %v1307_v41, %v447_v16  ;;  %1696 = vmatprep.mubr.f32.mxu0 %v476_v12 }
 0x274   :  { %1697 = vmatmul.mubr.f32.gmra.mrb[26].mxu0 %v477_v14  ;;  %v479_v20 = vmax.f32 %v453_v15, 0.0 }
 0x275   :  { %v478_v18 = vmax.f32 %v448_v17, 0.0  ;;  %v1648_v19 = vpop.f32.mrb[14].mxu1 }
 0x276   :  { %v463_v21 = vadd.f32 %v1648_v19, %v1307_v41  ;;  %v457_v37 = vpop.f32.mrb[15].mxu1 }
 0x277   :  { %v458_v38 = vadd.f32 %v1307_v41, %v457_v37  ;;  %1699 = vmatprep.mubr.f32.mxu0 %v478_v18  ;;  %v818_v41 = vld [vmem:[#allocation10 + $0x38] sm:$0xff] }
 0x278   :  { %1700 = vmatmul.mubr.f32.gmra.mrb[28].mxu0 %v479_v20  ;;  %v481_v42 = vmax.f32 %v463_v21, 0.0  ;;  %v2083_v53 = vpack.c.bf16 %v818_v41, %v817_v52 }
 0x279   :  { %v480_v39 = vmax.f32 %v458_v38, 0.0  ;;  %v825_v38 = vld [vmem:[#allocation10 + $0x70] sm:$0xff] }
 0x27a   :  { %2084 = vmatprep.subr.bf16.mxu0 %v2083_v53 }
 0x27b   :  { %1702 = vmatprep.mubr.f32.mxu0 %v480_v39  ;;  %2086 = vmatpush3.bf16.msra.mxu0 %v2083_v53  ;;  %v826_v39 = vld [vmem:[#allocation10 + $0x78] sm:$0xff] }
 0x27c   :  { %1703 = vmatmul.mubr.f32.gmra.mrb[30].mxu0 %v481_v42  ;;  %2088 = vmatprep.subr.bf16.mxu0 %v2087_v56  ;;  %v2099_v42 = vpack.c.bf16 %v826_v39, %v825_v38 }
 0x27f   :  { %2090 = vmatpush3.bf16.msra.mxu0 %v2087_v56 }
 0x280   :  { %2092 = vmatprep.subr.bf16.mxu0 %v2091_v59 }
 0x283   :  { %2094 = vmatpush3.bf16.msra.mxu0 %v2091_v59 }
 0x284   :  { %2096 = vmatprep.subr.bf16.mxu0 %v2095_v62 }
 0x287   :  { %2098 = vmatpush3.bf16.msra.mxu0 %v2095_v62 }
 0x288   :  { %2100 = vmatprep.subr.bf16.mxu0 %v2099_v42 }
 0x28b   :  { %2102 = vmatpush3.bf16.msra.mxu0 %v2099_v42 }
 0x333   :  { %v1683_v63 = vpop.f32.mrb[16].mxu0 }
 0x334   :  { %v564_v0 = vpop.f32.mrb[17].mxu0 }
 0x335   :  { %v2039_v1 = vpack.c.bf16 %v1683_v63, %v564_v0 }
 0x337   :  { %v1686_v2 = vpop.f32.mrb[18].mxu0  ;;  %2040 = vmatprep.subr.bf16.mxu1 %v2039_v1 }
 0x338   :  { %v574_v3 = vpop.f32.mrb[19].mxu0  ;;  %2042 = vmatpush3.bf16.msra.mxu1 %v2039_v1 }
 0x339   :  { %v2043_v4 = vpack.c.bf16 %v1686_v2, %v574_v3 }
 0x33b   :  { %v1689_v5 = vpop.f32.mrb[20].mxu0  ;;  %2044 = vmatprep.subr.bf16.mxu1 %v2043_v4 }
 0x33c   :  { %v584_v6 = vpop.f32.mrb[21].mxu0  ;;  %2046 = vmatpush3.bf16.msra.mxu1 %v2043_v4 }
 0x33d   :  { %v2047_v7 = vpack.c.bf16 %v1689_v5, %v584_v6 }
 0x33f   :  { %v1692_v8 = vpop.f32.mrb[22].mxu0  ;;  %2048 = vmatprep.subr.bf16.mxu1 %v2047_v7 }
 0x340   :  { %v594_v9 = vpop.f32.mrb[23].mxu0  ;;  %2050 = vmatpush3.bf16.msra.mxu1 %v2047_v7 }
 0x341   :  { %v2051_v10 = vpack.c.bf16 %v1692_v8, %v594_v9 }
 0x343   :  { %v1695_v11 = vpop.f32.mrb[24].mxu0  ;;  %2052 = vmatprep.subr.bf16.mxu1 %v2051_v10 }
 0x344   :  { %v604_v12 = vpop.f32.mrb[25].mxu0  ;;  %2054 = vmatpush3.bf16.msra.mxu1 %v2051_v10 }
 0x345   :  { %v2055_v13 = vpack.c.bf16 %v1695_v11, %v604_v12 }
 0x347   :  { %v1698_v14 = vpop.f32.mrb[26].mxu0  ;;  %2056 = vmatprep.subr.bf16.mxu1 %v2055_v13 }
 0x348   :  { %v614_v15 = vpop.f32.mrb[27].mxu0  ;;  %2058 = vmatpush3.bf16.msra.mxu1 %v2055_v13 }
 0x349   :  { %v2059_v16 = vpack.c.bf16 %v1698_v14, %v614_v15 }
 0x34b   :  { %v1701_v17 = vpop.f32.mrb[28].mxu0  ;;  %2060 = vmatprep.subr.bf16.mxu1 %v2059_v16 }
 0x34c   :  { %v624_v18 = vpop.f32.mrb[29].mxu0  ;;  %2062 = vmatpush3.bf16.msra.mxu1 %v2059_v16 }
 0x34d   :  { %v2063_v19 = vpack.c.bf16 %v1701_v17, %v624_v18 }
 0x34f   :  { %v1704_v20 = vpop.f32.mrb[30].mxu0  ;;  %2064 = vmatprep.subr.bf16.mxu1 %v2063_v19 }
 0x350   :  { %v634_v21 = vpop.f32.mrb[31].mxu0  ;;  %2066 = vmatpush3.bf16.msra.mxu1 %v2063_v19 }
 0x351   :  { %v2067_v37 = vpack.c.bf16 %v1704_v20, %v634_v21 }
 0x353   :  { %2068 = vmatprep.subr.bf16.mxu1 %v2067_v37 }
 0x354   :  { %2070 = vmatpush3.bf16.msra.mxu1 %v2067_v37 }
 0x357   :  { %1738 = vmatmul.mubr.f32.vlgmr.msra.gmra.mrb[16].mxu1 %v2545_v22 }
 0x358   :  { %1740 = vmatprep.mubr.f32.mxu1 %v2547_v23 }
 0x35b   :  { %1741 = vmatmul.mubr.f32.gmra.mrb[18].mxu1 %v2551_v24 }
 0x35c   :  { %1743 = vmatprep.mubr.f32.mxu1 %v2553_v25 }
 0x35f   :  { %1744 = vmatmul.mubr.f32.gmra.mrb[20].mxu1 %v2557_v26 }
 0x360   :  { %1746 = vmatprep.mubr.f32.mxu1 %v2559_v27 }
 0x363   :  { %1747 = vmatmul.mubr.f32.gmra.mrb[22].mxu1 %v2563_v28 }
 0x364   :  { %1749 = vmatprep.mubr.f32.mxu1 %v2565_v29 }
 0x367   :  { %1750 = vmatmul.mubr.f32.gmra.mrb[24].mxu1 %v2569_v30 }
 0x368   :  { %1752 = vmatprep.mubr.f32.mxu1 %v2571_v31 }
 0x36b   :  { %1753 = vmatmul.mubr.f32.gmra.mrb[26].mxu1 %v2575_v32 }
 0x36c   :  { %1755 = vmatprep.mubr.f32.mxu1 %v2577_v33 }
 0x36f   :  { %1756 = vmatmul.mubr.f32.gmra.mrb[28].mxu1 %v2581_v34 }
 0x370   :  { %1758 = vmatprep.mubr.f32.mxu1 %v2583_v35 }
 0x373   :  { %1759 = vmatmul.mubr.f32.gmra.mrb[30].mxu1 %v2587_v36 }
 0x374   :  { %1849 = vmatprep.mubr.f32.mxu1 %v2542_v40 }
 0x42a   :  { %v1739_v44 = vpop.f32.mrb[16].mxu1 }
 0x42b   :  { %v722_v45 = vadd.f32 %v1739_v44, %v1308_v43  ;;  %v716_v46 = vpop.f32.mrb[17].mxu1 }
 0x42c   :  { %v717_v47 = vadd.f32 %v1308_v43, %v716_v46 }
 0x42d   :  { %v796_v50 = vmax.f32 %v722_v45, 0.0 }
 0x42e   :  { %v795_v48 = vmax.f32 %v717_v47, 0.0  ;;  %v1742_v49 = vpop.f32.mrb[18].mxu1 }
 0x42f   :  { %v732_v51 = vadd.f32 %v1742_v49, %v1308_v43  ;;  %v726_v52 = vpop.f32.mrb[19].mxu1 }
 0x430   :  { %v727_v41 = vadd.f32 %v1308_v43, %v726_v52  ;;  %1793 = vmatprep.mubr.f32.mxu0 %v795_v48 }
 0x431   :  { %1794 = vmatmul.mubr.f32.vlgmr.msra.gmra.mrb[32].mxu0 %v796_v50  ;;  %v798_v54 = vmax.f32 %v732_v51, 0.0 }
 0x432   :  { %v797_v40 = vmax.f32 %v727_v41, 0.0  ;;  %v1745_v53 = vpop.f32.mrb[20].mxu1 }
 0x433   :  { %v742_v55 = vadd.f32 %v1745_v53, %v1308_v43  ;;  %v736_v56 = vpop.f32.mrb[21].mxu1 }
 0x434   :  { %v737_v57 = vadd.f32 %v1308_v43, %v736_v56  ;;  %1796 = vmatprep.mubr.f32.mxu0 %v797_v40 }
 0x435   :  { %1797 = vmatmul.mubr.f32.gmra.mrb[34].mxu0 %v798_v54  ;;  %v800_v60 = vmax.f32 %v742_v55, 0.0 }
 0x436   :  { %v799_v58 = vmax.f32 %v737_v57, 0.0  ;;  %v1748_v59 = vpop.f32.mrb[22].mxu1 }
 0x437   :  { %v752_v61 = vadd.f32 %v1748_v59, %v1308_v43  ;;  %v746_v62 = vpop.f32.mrb[23].mxu1 }
 0x438   :  { %v747_v63 = vadd.f32 %v1308_v43, %v746_v62  ;;  %1799 = vmatprep.mubr.f32.mxu0 %v799_v58 }
 0x439   :  { %1800 = vmatmul.mubr.f32.gmra.mrb[36].mxu0 %v800_v60  ;;  %v802_v2 = vmax.f32 %v752_v61, 0.0 }
 0x43a   :  { %v801_v0 = vmax.f32 %v747_v63, 0.0  ;;  %v1751_v1 = vpop.f32.mrb[24].mxu1 }
 0x43b   :  { %v762_v3 = vadd.f32 %v1751_v1, %v1308_v43  ;;  %v756_v4 = vpop.f32.mrb[25].mxu1  ;;  %v1204_v1 = vld [vmem:[#allocation11 + $0x48] sm:$0xff] }
 0x43c   :  { %v757_v5 = vadd.f32 %v1308_v43, %v756_v4  ;;  %1802 = vmatprep.mubr.f32.mxu0 %v801_v0  ;;  %v1206_v4 = vld [vmem:[#allocation11 + $0x58] sm:$0xff] }
 0x43d   :  { %1803 = vmatmul.mubr.f32.gmra.mrb[38].mxu0 %v802_v2  ;;  %v804_v8 = vmax.f32 %v762_v3, 0.0  ;;  %v1205_v3 = vld [vmem:[#allocation11 + $0x50] sm:$0xff] }
 0x43e   :  { %v803_v6 = vmax.f32 %v757_v5, 0.0  ;;  %v1754_v7 = vpop.f32.mrb[26].mxu1  ;;  %v2175_v5 = vpack.c.bf16 %v1206_v4, %v1205_v3 }
 0x43f   :  { %v772_v9 = vadd.f32 %v1754_v7, %v1308_v43  ;;  %v766_v10 = vpop.f32.mrb[27].mxu1  ;;  %v1208_v7 = vld [vmem:[#allocation11 + $0x68] sm:$0xff] }
 0x440   :  { %v767_v11 = vadd.f32 %v1308_v43, %v766_v10  ;;  %1805 = vmatprep.mubr.f32.mxu0 %v803_v6  ;;  %v1207_v6 = vld [vmem:[#allocation11 + $0x60] sm:$0xff]  ;;  %v1210_v10 = vld [vmem:[#allocation11 + $0x78] sm:$0xff] }
 0x441   :  { %1806 = vmatmul.mubr.f32.gmra.mrb[40].mxu0 %v804_v8  ;;  %v806_v14 = vmax.f32 %v772_v9, 0.0  ;;  %v2178_v8 = vpack.c.bf16 %v1208_v7, %v1207_v6  ;;  %v1209_v9 = vld [vmem:[#allocation11 + $0x70] sm:$0xff] }
 0x442   :  { %v805_v12 = vmax.f32 %v767_v11, 0.0  ;;  %v1757_v13 = vpop.f32.mrb[28].mxu1  ;;  %v2181_v11 = vpack.c.bf16 %v1210_v10, %v1209_v9 }
 0x443   :  { %v782_v15 = vadd.f32 %v1757_v13, %v1308_v43  ;;  %v776_v16 = vpop.f32.mrb[29].mxu1 }
 0x444   :  { %v777_v17 = vadd.f32 %v1308_v43, %v776_v16  ;;  %1808 = vmatprep.mubr.f32.mxu0 %v805_v12  ;;  %v1309_v12 = vld [vmem:[%s2672_s7] ss:$0 sm:$0xff] }
 0x445   :  { %1809 = vmatmul.mubr.f32.gmra.mrb[42].mxu0 %v806_v14  ;;  %v808_v20 = vmax.f32 %v782_v15, 0.0 }
 0x446   :  { %v807_v18 = vmax.f32 %v777_v17, 0.0  ;;  %v1760_v19 = vpop.f32.mrb[30].mxu1 }
 0x447   :  { %v792_v21 = vadd.f32 %v1760_v19, %v1308_v43  ;;  %v786_v37 = vpop.f32.mrb[31].mxu1 }
 0x448   :  { %v787_v38 = vadd.f32 %v1308_v43, %v786_v37  ;;  %1811 = vmatprep.mubr.f32.mxu0 %v807_v18 }
 0x449   :  { %1812 = vmatmul.mubr.f32.gmra.mrb[44].mxu0 %v808_v20  ;;  %v810_v42 = vmax.f32 %v792_v21, 0.0 }
 0x44a   :  { %v809_v39 = vmax.f32 %v787_v38, 0.0 }
 0x44c   :  { %1814 = vmatprep.mubr.f32.mxu0 %v809_v39 }
 0x44d   :  { %1815 = vmatmul.mubr.f32.gmra.mrb[46].mxu0 %v810_v42 }
 0x504   :  { %v1795_v44 = vpop.f32.mrb[32].mxu0 }
 0x505   :  { %v893_v45 = vpop.f32.mrb[33].mxu0 }
 0x506   :  { %v2103_v46 = vpack.c.bf16 %v1795_v44, %v893_v45 }
 0x508   :  { %v1798_v47 = vpop.f32.mrb[34].mxu0  ;;  %2104 = vmatprep.subr.bf16.mxu1 %v2103_v46 }
 0x509   :  { %v903_v48 = vpop.f32.mrb[35].mxu0  ;;  %2106 = vmatpush3.bf16.msra.mxu1 %v2103_v46 }
 0x50a   :  { %v2107_v49 = vpack.c.bf16 %v1798_v47, %v903_v48 }
 0x50c   :  { %v1801_v50 = vpop.f32.mrb[36].mxu0  ;;  %2108 = vmatprep.subr.bf16.mxu1 %v2107_v49 }
 0x50d   :  { %v913_v51 = vpop.f32.mrb[37].mxu0  ;;  %2110 = vmatpush3.bf16.msra.mxu1 %v2107_v49 }
 0x50e   :  { %v2111_v52 = vpack.c.bf16 %v1801_v50, %v913_v51 }
 0x510   :  { %v1804_v43 = vpop.f32.mrb[38].mxu0  ;;  %2112 = vmatprep.subr.bf16.mxu1 %v2111_v52 }
 0x511   :  { %v923_v41 = vpop.f32.mrb[39].mxu0  ;;  %2114 = vmatpush3.bf16.msra.mxu1 %v2111_v52 }
 0x512   :  { %v2115_v40 = vpack.c.bf16 %v1804_v43, %v923_v41 }
 0x514   :  { %v1807_v53 = vpop.f32.mrb[40].mxu0  ;;  %2116 = vmatprep.subr.bf16.mxu1 %v2115_v40 }
 0x515   :  { %v933_v54 = vpop.f32.mrb[41].mxu0  ;;  %2118 = vmatpush3.bf16.msra.mxu1 %v2115_v40 }
 0x516   :  { %v2119_v55 = vpack.c.bf16 %v1807_v53, %v933_v54 }
 0x518   :  { %v1810_v56 = vpop.f32.mrb[42].mxu0  ;;  %2120 = vmatprep.subr.bf16.mxu1 %v2119_v55 }
 0x519   :  { %v943_v57 = vpop.f32.mrb[43].mxu0  ;;  %2122 = vmatpush3.bf16.msra.mxu1 %v2119_v55 }
 0x51a   :  { %v2123_v58 = vpack.c.bf16 %v1810_v56, %v943_v57 }
 0x51c   :  { %v1813_v59 = vpop.f32.mrb[44].mxu0  ;;  %2124 = vmatprep.subr.bf16.mxu1 %v2123_v58 }
 0x51d   :  { %v953_v60 = vpop.f32.mrb[45].mxu0  ;;  %2126 = vmatpush3.bf16.msra.mxu1 %v2123_v58 }
 0x51e   :  { %v2127_v61 = vpack.c.bf16 %v1813_v59, %v953_v60 }
 0x520   :  { %v1816_v62 = vpop.f32.mrb[46].mxu0  ;;  %2128 = vmatprep.subr.bf16.mxu1 %v2127_v61 }
 0x521   :  { %v963_v63 = vpop.f32.mrb[47].mxu0  ;;  %2130 = vmatpush3.bf16.msra.mxu1 %v2127_v61 }
 0x522   :  { %v2131_v0 = vpack.c.bf16 %v1816_v62, %v963_v63 }
 0x524   :  { %2132 = vmatprep.subr.bf16.mxu1 %v2131_v0 }
 0x525   :  { %2134 = vmatpush3.bf16.msra.mxu1 %v2131_v0 }
 0x528   :  { %1850 = vmatmul.mubr.f32.vlgmr.msra.gmra.mrb[32].mxu1 %v2545_v22  ;;  %v2367_v22 = vmov 0.0|0.0  }
 0x529   :  { %1852 = vmatprep.mubr.f32.mxu1 %v2547_v23  ;;  %2135 = vmatprep.subr.bf16.mxu0 %v2367_v22  ;;  %v2369_v23 = vmov 0.0  }
 0x52a   :  { %2159 = vmatprep.subr.bf16.mxu1 %v2367_v22  ;;  %1905 = vmatprep.mubr.msk.f32.mxu0 %vm2368_vm0, %v2369_v23 }
 0x52c   :  { %1853 = vmatmul.mubr.f32.gmra.mrb[34].mxu1 %v2551_v24  ;;  %v1195_v24 = vld [vmem:[#allocation11] sm:$0xff] }
 0x52d   :  { %1855 = vmatprep.mubr.f32.mxu1 %v2553_v25  ;;  %v1196_v25 = vld [vmem:[#allocation11 + $0x8] sm:$0xff] }
 0x530   :  { %1856 = vmatmul.mubr.f32.gmra.mrb[36].mxu1 %v2557_v26  ;;  %v1197_v26 = vld [vmem:[#allocation11 + $0x10] sm:$0xff] }
 0x531   :  { %1858 = vmatprep.mubr.f32.mxu1 %v2559_v27  ;;  %v2160_v27 = vpack.c.bf16 %v1196_v25, %v1195_v24 }
 0x533   :  { %2161 = vmatpush3.bf16.msra.mxu1 %v2160_v27 }
 0x534   :  { %1859 = vmatmul.mubr.f32.gmra.mrb[38].mxu1 %v2563_v28  ;;  %v1198_v28 = vld [vmem:[#allocation11 + $0x18] sm:$0xff]  ;;  %2162 = vmatprep.subr.bf16.mxu1 %v2367_v22 }
 0x535   :  { %1861 = vmatprep.mubr.f32.mxu1 %v2565_v29  ;;  %v2163_v29 = vpack.c.bf16 %v1198_v28, %v1197_v26  ;;  %v1124_v26 = vld [vmem:[%s2673_s8] sm:$0xff] }
 0x537   :  { %2164 = vmatpush3.bf16.msra.mxu1 %v2163_v29  ;;  %v1310_v29 = vld [vmem:[%s2675_s10] ss:$0 sm:$0xff] }
 0x538   :  { %1862 = vmatmul.mubr.f32.gmra.mrb[40].mxu1 %v2569_v30  ;;  %v1199_v30 = vld [vmem:[#allocation11 + $0x20] sm:$0xff]  ;;  %2165 = vmatprep.subr.bf16.mxu1 %v2367_v22 }
 0x539   :  { %1864 = vmatprep.mubr.f32.mxu1 %v2571_v31  ;;  %v1200_v31 = vld [vmem:[#allocation11 + $0x28] sm:$0xff] }
 0x53c   :  { %1865 = vmatmul.mubr.f32.gmra.mrb[42].mxu1 %v2575_v32  ;;  %v2166_v32 = vpack.c.bf16 %v1200_v31, %v1199_v30 }
 0x53d   :  { %1867 = vmatprep.mubr.f32.mxu1 %v2577_v33  ;;  %v1201_v33 = vld [vmem:[#allocation11 + $0x30] sm:$0xff] }
 0x53e   :  { %2167 = vmatpush3.bf16.msra.mxu1 %v2166_v32 }
 0x53f   :  { %2168 = vmatprep.subr.bf16.mxu1 %v2367_v22 }
 0x540   :  { %1868 = vmatmul.mubr.f32.gmra.mrb[44].mxu1 %v2581_v34  ;;  %v1202_v34 = vld [vmem:[#allocation11 + $0x38] sm:$0xff] }
 0x541   :  { %1870 = vmatprep.mubr.f32.mxu1 %v2583_v35  ;;  %v2169_v35 = vpack.c.bf16 %v1202_v34, %v1201_v33 }
 0x543   :  { %2170 = vmatpush3.bf16.msra.mxu1 %v2169_v35 }
 0x544   :  { %1871 = vmatmul.mubr.f32.gmra.mrb[46].mxu1 %v2587_v36  ;;  %v1203_v36 = vld [vmem:[#allocation11 + $0x40] sm:$0xff]  ;;  %2171 = vmatprep.subr.bf16.mxu1 %v2367_v22 }
 0x545   :  { %1940 = vmatprep.mubr.msk.f32.mxu1 %vm2368_vm0, %v2369_v23  ;;  %v2172_v2 = vpack.c.bf16 %v1204_v1, %v1203_v36 }
 0x547   :  { %2173 = vmatpush3.bf16.msra.mxu1 %v2172_v2 }
 0x548   :  { %2174 = vmatprep.subr.bf16.mxu1 %v2367_v22 }
 0x54b   :  { %2176 = vmatpush3.bf16.msra.mxu1 %v2175_v5 }
 0x54c   :  { %2177 = vmatprep.subr.bf16.mxu1 %v2367_v22 }
 0x54f   :  { %2179 = vmatpush3.bf16.msra.mxu1 %v2178_v8 }
 0x550   :  { %2180 = vmatprep.subr.bf16.mxu1 %v2367_v22 }
 0x553   :  { %2182 = vmatpush3.bf16.msra.mxu1 %v2181_v11 }
 0x5fb   :  { %v1851_v13 = vpop.f32.mrb[32].mxu1 }
 0x5fc   :  { %v1051_v14 = vadd.f32 %v1851_v13, %v1309_v12  ;;  %v1045_v15 = vpop.f32.mrb[33].mxu1 }
 0x5fd   :  { %v1046_v16 = vadd.f32 %v1309_v12, %v1045_v15 }
 0x5ff   :  { %v2136_v17 = vpack.c.bf16 %v1051_v14, %v1046_v16  ;;  %v1854_v18 = vpop.f32.mrb[34].mxu1 }
 0x600   :  { %v1061_v19 = vadd.f32 %v1854_v18, %v1309_v12  ;;  %v1055_v20 = vpop.f32.mrb[35].mxu1 }
 0x601   :  { %v1056_v21 = vadd.f32 %v1309_v12, %v1055_v20  ;;  %2137 = vmatpush3.bf16.msra.mxu0 %v2136_v17 }
 0x602   :  { %2138 = vmatprep.subr.bf16.mxu0 %v2367_v22 }
 0x603   :  { %v2139_v37 = vpack.c.bf16 %v1061_v19, %v1056_v21  ;;  %v1857_v38 = vpop.f32.mrb[36].mxu1 }
 0x604   :  { %v1071_v39 = vadd.f32 %v1857_v38, %v1309_v12  ;;  %v1065_v42 = vpop.f32.mrb[37].mxu1 }
 0x605   :  { %v1066_v44 = vadd.f32 %v1309_v12, %v1065_v42  ;;  %2140 = vmatpush3.bf16.msra.mxu0 %v2139_v37 }
 0x606   :  { %2141 = vmatprep.subr.bf16.mxu0 %v2367_v22 }
 0x607   :  { %v2142_v45 = vpack.c.bf16 %v1071_v39, %v1066_v44  ;;  %v1860_v46 = vpop.f32.mrb[38].mxu1 }
 0x608   :  { %v1081_v47 = vadd.f32 %v1860_v46, %v1309_v12  ;;  %v1075_v48 = vpop.f32.mrb[39].mxu1 }
 0x609   :  { %v1076_v49 = vadd.f32 %v1309_v12, %v1075_v48  ;;  %2143 = vmatpush3.bf16.msra.mxu0 %v2142_v45 }
 0x60a   :  { %2144 = vmatprep.subr.bf16.mxu0 %v2367_v22 }
 0x60b   :  { %v2145_v50 = vpack.c.bf16 %v1081_v47, %v1076_v49  ;;  %v1863_v51 = vpop.f32.mrb[40].mxu1 }
 0x60c   :  { %v1091_v52 = vadd.f32 %v1863_v51, %v1309_v12  ;;  %v1085_v43 = vpop.f32.mrb[41].mxu1 }
 0x60d   :  { %v1086_v41 = vadd.f32 %v1309_v12, %v1085_v43  ;;  %2146 = vmatpush3.bf16.msra.mxu0 %v2145_v50 }
 0x60e   :  { %2147 = vmatprep.subr.bf16.mxu0 %v2367_v22 }
 0x60f   :  { %v2148_v40 = vpack.c.bf16 %v1091_v52, %v1086_v41  ;;  %v1866_v53 = vpop.f32.mrb[42].mxu1 }
 0x610   :  { %v1101_v54 = vadd.f32 %v1866_v53, %v1309_v12  ;;  %v1095_v55 = vpop.f32.mrb[43].mxu1 }
 0x611   :  { %v1096_v56 = vadd.f32 %v1309_v12, %v1095_v55  ;;  %2149 = vmatpush3.bf16.msra.mxu0 %v2148_v40 }
 0x612   :  { %2150 = vmatprep.subr.bf16.mxu0 %v2367_v22 }
 0x613   :  { %v2151_v57 = vpack.c.bf16 %v1101_v54, %v1096_v56  ;;  %v1869_v58 = vpop.f32.mrb[44].mxu1 }
 0x614   :  { %v1111_v59 = vadd.f32 %v1869_v58, %v1309_v12  ;;  %v1105_v60 = vpop.f32.mrb[45].mxu1 }
 0x615   :  { %v1106_v61 = vadd.f32 %v1309_v12, %v1105_v60  ;;  %2152 = vmatpush3.bf16.msra.mxu0 %v2151_v57 }
 0x616   :  { %2153 = vmatprep.subr.bf16.mxu0 %v2367_v22 }
 0x617   :  { %v2154_v62 = vpack.c.bf16 %v1111_v59, %v1106_v61  ;;  %v1872_v63 = vpop.f32.mrb[46].mxu1 }
 0x618   :  { %v1121_v0 = vadd.f32 %v1872_v63, %v1309_v12  ;;  %v1115_v23 = vpop.f32.mrb[47].mxu1 }
 0x619   :  { %v1116_v24 = vadd.f32 %v1309_v12, %v1115_v23  ;;  %2155 = vmatpush3.bf16.msra.mxu0 %v2154_v62 }
 0x61a   :  { %2156 = vmatprep.subr.bf16.mxu0 %v2367_v22 }
 0x61b   :  { %v2157_v25 = vpack.c.bf16 %v1121_v0, %v1116_v24 }
 0x61d   :  { %2158 = vmatpush3.bf16.msra.mxu0 %v2157_v25 }
 0x620   :  { %1906 = vmatmul.mubr.f32.vlgmr.msra.gmra.mrb[48].mxu0 %v1124_v26 }
 0x6f3   :  { %v1191_v27 = vpop.f32.mrb[48].mxu0 }
 0x6f4   :  { %v1907_v28 = vpop.f32.mrb[49].mxu0  ;;  %1941 = vmatmul.mubr.f32.vlgmr.msra.gmra.mrb[48].mxu1 %v1191_v27 }
 0x7c7   :  { %v1284_v30 = vpop.f32.mrb[48].mxu1 }
 0x7c8   :  { %v1285_v31 = vadd.f32 %v1310_v29, %v1284_v30  ;;  %v1942_v32 = vpop.f32.mrb[49].mxu1 }
 0x7ca   :  { %1288 = vst [vmem:[#allocation13] sm:$0xff] %v1285_v31 }
 0x7cb   :  { %2338 = shalt.err (!%p2335_p10)
}
 0x7cc   :  { %s2339_s22 = scalar_lea.hbm %s2676_s11, 128 }
 0x7cd   :  { %p2340_p11 = scmp.ne.s32.totalorder %s2676_s11, %s2339_s22  ;;  %p2343_p12 = scmp.lt.u32.totalorder %s2339_s22, %s2676_s11 }
 0x7cf   :  { %p2345_p13 = pnand %p2343_p12, %p2340_p11 }
 0x7d1   :  { %2348 = shalt.err (!%p2345_p13)
}
 0x7d2   :  { %1298 = dma.vmem_to_hbm [thread:$0]  %s1296_s20, 128, %s2676_s11, [#allocation4]  }
 0x7d3   :  { %2357 = dma.done.wait [#allocation4], 128  }
 0x7d4   :  { %2358 = vsyncadd [#allocation4], 4294967168 }
 0x7d5   :  { %1302 = vsyncpa [#allocation3], 1 }
 0x7d6   :  { %1303 = vsyncpa [#allocation6], 1 }
 0x7d7   :  { %1304 = vsyncpa [#allocation9], 1 }
 0x7d8   :  { %1305 = vsyncpa [#allocation12], 1 }
 0x7d9   :  { %1306 = vsyncpa [#allocation4], 1 }

</bundles_post_ra>
